<compile_context>
chip_gen: v6e
topology: v6e:2x2x1
jax: 0.10.0
libtpu: 0.0.40
codegen_flags: <defaults>
</compile_context>

<pallas_src>
import math

import jax
import jax.numpy as jnp
from jax.experimental import pallas as pl
from jax.experimental.pallas import tpu as pltpu

MAIN_DIM = 52
AUX_DIM = 3
OUT_DIM = MAIN_DIM + AUX_DIM

_TM_CAP = 1024                            # rows; amortizes ~0.35us per grid step
_WORKING_SET_BUDGET = 28 * 1024 * 1024    # pipeline-buffer budget used to size tm
_VMEM_LIMIT_BYTES = 48 * 1024 * 1024      # > v5e/v6e scoped defaults, <= v7x 64 MiB


def _cdiv(a, b):
    return -(-a // b)


def _round_up(x, m):
    return _cdiv(x, m) * m


def _split_proj_kernel(x_ref, w_ref, b_ref, scale_ref, offset_ref, o_ref):
    # x_ref: (TM, D)  w_ref: (D, OUT)  b/scale/offset: (1, OUT)  o_ref: (TM, OUT)
    #
    # W's "main" columns and b's "main" entries are pre-scaled by 0.5 on the
    # host so sigmoid(z) = 0.5*tanh(z/2) + 0.5 becomes a single tanh followed
    # by a per-column affine.  One EUP transcendental per element; no
    # iota/compare/select on the VPU.
    y = jnp.dot(x_ref[...], w_ref[...], preferred_element_type=jnp.float32)
    y = y + b_ref[...]                       # (1, OUT) broadcasts over rows
    t = jnp.tanh(y)
    o_ref[...] = (t * scale_ref[...] + offset_ref[...]).astype(o_ref.dtype)


def _choose_tm(m, d_model, x_itemsize, w_itemsize, out_itemsize):
    """Largest row tile (multiple of 8) whose working set fits the VMEM budget,
    clamped so the grid still has several steps (v7x 2-TC sharding)."""
    resident = 2 * d_model * OUT_DIM * w_itemsize + 6 * OUT_DIM * 4   # W + consts
    per_row = 2 * d_model * x_itemsize + 2 * OUT_DIM * out_itemsize   # x + out (x2 buf)
    tm = (_WORKING_SET_BUDGET - resident) // per_row
    tm = max(8, min(_TM_CAP, (tm // 8) * 8))
    tm = min(tm, _round_up(m, 8))                       # never bigger than problem
    min_steps = min(4, _cdiv(m, 8))                     # keep both TCs busy (v7x)
    tm = min(tm, _round_up(_cdiv(m, min_steps), 8))
    return max(8, tm)


def prepare_params(w_main, b_main, w_aux, b_aux, *, param_dtype=None):
    """Fuse the two linears and fold the sigmoid rewrite into the weights.

      sigmoid(x @ Wm + bm) = 0.5 * tanh(x @ (Wm/2) + bm/2) + 0.5
      tanh   (x @ Wa + ba) = 1.0 * tanh(x @  Wa    + ba  ) + 0.0
    """
    param_dtype = param_dtype or w_main.dtype
    w = jnp.concatenate([0.5 * w_main, w_aux], axis=1).astype(param_dtype)        # (D, 55)
    b = jnp.concatenate([0.5 * b_main, b_aux], axis=0).astype(jnp.float32)
    b = b.reshape(1, OUT_DIM)
    scale = jnp.concatenate(
        [jnp.full((MAIN_DIM,), 0.5, jnp.float32), jnp.ones((AUX_DIM,), jnp.float32)]
    ).reshape(1, OUT_DIM)
    offset = jnp.concatenate(
        [jnp.full((MAIN_DIM,), 0.5, jnp.float32), jnp.zeros((AUX_DIM,), jnp.float32)]
    ).reshape(1, OUT_DIM)
    return w, b, scale, offset


def split_output_projection(x, params, *, tm=None):
    """x: (..., d_model); params from prepare_params(). Returns (..., 55)."""
    w, b, scale, offset = params
    orig_shape = x.shape
    d_model = orig_shape[-1]
    x2d = x.reshape(-1, d_model)
    m = x2d.shape[0]

    if tm is None:
        tm = _choose_tm(m, d_model, x2d.dtype.itemsize, w.dtype.itemsize,
                        x2d.dtype.itemsize)
    else:
        tm = max(8, (min(tm, _round_up(m, 8)) // 8) * 8)

    grid = (_cdiv(m, tm),)   # ragged final block handled by Pallas (no jnp.pad)

    cost = pl.CostEstimate(
        flops=2 * m * d_model * OUT_DIM,
        transcendentals=m * OUT_DIM,
        bytes_accessed=(m * d_model * x2d.dtype.itemsize
                        + m * OUT_DIM * x2d.dtype.itemsize
                        + d_model * OUT_DIM * w.dtype.itemsize),
    )

    out = pl.pallas_call(
        _split_proj_kernel,
        out_shape=jax.ShapeDtypeStruct((m, OUT_DIM), x.dtype),
        grid=grid,
        in_specs=[
            # x: new row tile every grid step (auto double-buffered pipeline).
            pl.BlockSpec((tm, d_model), lambda i: (i, 0)),
            # W, b, scale, offset: constant index map -> resident in VMEM.
            pl.BlockSpec((d_model, OUT_DIM), lambda i: (0, 0)),
            pl.BlockSpec((1, OUT_DIM), lambda i: (0, 0)),
            pl.BlockSpec((1, OUT_DIM), lambda i: (0, 0)),
            pl.BlockSpec((1, OUT_DIM), lambda i: (0, 0)),
        ],
        out_specs=pl.BlockSpec((tm, OUT_DIM), lambda i: (i, 0)),
        compiler_params=pltpu.CompilerParams(
            dimension_semantics=("parallel",),       # rows independent (v7x 2-TC)
            vmem_limit_bytes=_VMEM_LIMIT_BYTES,
        ),
        cost_estimate=cost,
    )(x2d, w, b, scale, offset)

    return out.reshape(*orig_shape[:-1], OUT_DIM)


def init_raw_params(key, d_model):
    """Deterministic init mimicking nn.Linear defaults (uniform +-1/sqrt(fan_in))."""
    k1, k2, k3, k4 = jax.random.split(key, 4)
    bound = 1.0 / math.sqrt(d_model)
    w_main = jax.random.uniform(k1, (d_model, MAIN_DIM), jnp.float32, -bound, bound)
    b_main = jax.random.uniform(k2, (MAIN_DIM,), jnp.float32, -bound, bound)
    w_aux = jax.random.uniform(k3, (d_model, AUX_DIM), jnp.float32, -bound, bound)
    b_aux = jax.random.uniform(k4, (AUX_DIM,), jnp.float32, -bound, bound)
    return w_main, b_main, w_aux, b_aux


def reference(x, w_main, b_main, w_aux, b_aux):
    main = jax.nn.sigmoid(x @ w_main + b_main)
    aux = jnp.tanh(x @ w_aux + b_aux)
    return jnp.concatenate([main, aux], axis=-1)


if __name__ == "__main__":
    key = jax.random.PRNGKey(0)
    kx, kp = jax.random.split(key)

    batch, seq, d_model = 2, 8, 32
    x = jax.random.normal(kx, (batch, seq, d_model), jnp.float32)

    w_main, b_main, w_aux, b_aux = init_raw_params(kp, d_model)
    params = prepare_params(w_main, b_main, w_aux, b_aux)

    out = jax.block_until_ready(split_output_projection(x, params))
    ref = reference(x, w_main, b_main, w_aux, b_aux)
    assert out.shape == (batch, seq, OUT_DIM), out.shape
    assert jnp.allclose(out, ref, atol=1e-5, rtol=1e-5), "mismatch vs reference"

    # Ragged-tail path: M = 519 is not a multiple of the tile; no host padding,
    # the last (partial) block is masked by Pallas on write-back.
    x2 = jax.random.normal(kx, (3, 173, d_model), jnp.float32)
    out2 = jax.block_until_ready(split_output_projection(x2, params, tm=64))
    ref2 = reference(x2, w_main, b_main, w_aux, b_aux)
    assert out2.shape == (3, 173, OUT_DIM), out2.shape
    assert jnp.allclose(out2, ref2, atol=1e-5, rtol=1e-5), "mismatch (ragged path)"

    print("KERNEL_OK")
</pallas_src>

<mosaic_0001>
module attributes {stable_mosaic.version = 11 : i64} {
  func.func @_split_proj_kernel(%arg0: i32, %arg1: memref<8x32xf32, #tpu.memory_space<vmem>>, %arg2: memref<32x55xf32, #tpu.memory_space<vmem>>, %arg3: memref<1x55xf32, #tpu.memory_space<vmem>>, %arg4: memref<1x55xf32, #tpu.memory_space<vmem>>, %arg5: memref<1x55xf32, #tpu.memory_space<vmem>>, %arg6: memref<8x55xf32, #tpu.memory_space<vmem>>) attributes {dimension_semantics = [#tpu.dimension_semantics<parallel>], iteration_bounds = array<i64: 2>, scalar_prefetch = 0 : i64, scratch_operands = 0 : i64, tpu.core_type = #tpu.core_type<tc>, window_params = [{transform_indices = @transform_0, window_bounds = array<i64: 8, 32>}, {pipeline_mode = #tpu.pipeline_mode<synchronous>, transform_indices = @transform_1, window_bounds = array<i64: 32, 55>}, {pipeline_mode = #tpu.pipeline_mode<synchronous>, transform_indices = @transform_2, window_bounds = array<i64: 1, 55>}, {pipeline_mode = #tpu.pipeline_mode<synchronous>, transform_indices = @transform_3, window_bounds = array<i64: 1, 55>}, {pipeline_mode = #tpu.pipeline_mode<synchronous>, transform_indices = @transform_4, window_bounds = array<i64: 1, 55>}, {transform_indices = @transform_5, window_bounds = array<i64: 8, 55>}]} {
    %c0 = arith.constant 0 : index
    %c0_0 = arith.constant 0 : index
    %0 = vector.load %arg1[%c0, %c0_0] : memref<8x32xf32, #tpu.memory_space<vmem>>, vector<8x32xf32>
    %c0_1 = arith.constant 0 : index
    %c0_2 = arith.constant 0 : index
    %1 = vector.load %arg2[%c0_1, %c0_2] : memref<32x55xf32, #tpu.memory_space<vmem>>, vector<32x55xf32>
    %cst = arith.constant dense<0.000000e+00> : vector<8x55xf32>
    %2 = tpu.matmul %0, %1, %cst {dimension_numbers = #tpu.dot_dimension_numbers<[1], [0], [0], [1], [0, 0, 1, 1], [], []>} : vector<8x32xf32>, vector<32x55xf32>, vector<8x55xf32> -> vector<8x55xf32>
    %c0_3 = arith.constant 0 : index
    %c0_4 = arith.constant 0 : index
    %3 = vector.load %arg3[%c0_3, %c0_4] : memref<1x55xf32, #tpu.memory_space<vmem>>, vector<1x55xf32>
    %4 = vector.broadcast %3 : vector<1x55xf32> to vector<8x55xf32>
    %5 = arith.addf %2, %4 : vector<8x55xf32>
    %6 = math.tanh %5 : vector<8x55xf32>
    %c0_5 = arith.constant 0 : index
    %c0_6 = arith.constant 0 : index
    %7 = vector.load %arg4[%c0_5, %c0_6] : memref<1x55xf32, #tpu.memory_space<vmem>>, vector<1x55xf32>
    %8 = vector.broadcast %7 : vector<1x55xf32> to vector<8x55xf32>
    %9 = arith.mulf %6, %8 : vector<8x55xf32>
    %c0_7 = arith.constant 0 : index
    %c0_8 = arith.constant 0 : index
    %10 = vector.load %arg5[%c0_7, %c0_8] : memref<1x55xf32, #tpu.memory_space<vmem>>, vector<1x55xf32>
    %11 = vector.broadcast %10 : vector<1x55xf32> to vector<8x55xf32>
    %12 = arith.addf %9, %11 : vector<8x55xf32>
    %c0_9 = arith.constant 0 : index
    %c0_10 = arith.constant 0 : index
    %13 = vector.load %arg6[%c0_9, %c0_10] : memref<8x55xf32, #tpu.memory_space<vmem>>, vector<8x55xf32>
    tpu.vector_store %arg6[%c0_9, %c0_10], %12 {strides = array<i32>} : memref<8x55xf32, #tpu.memory_space<vmem>>, vector<8x55xf32>,
    return
  }
  func.func @transform_0(%arg0: i32) -> (i32, i32) {
    %c0_i32 = arith.constant 0 : i32
    %c0_i32_0 = arith.constant 0 : i32
    return %arg0, %c0_i32 : i32, i32
  }
  func.func @transform_1(%arg0: i32) -> (i32, i32) {
    %c0_i32 = arith.constant 0 : i32
    %c0_i32_0 = arith.constant 0 : i32
    %c0_i32_1 = arith.constant 0 : i32
    return %c0_i32, %c0_i32_0 : i32, i32
  }
  func.func @transform_2(%arg0: i32) -> (i32, i32) {
    %c0_i32 = arith.constant 0 : i32
    %c0_i32_0 = arith.constant 0 : i32
    %c0_i32_1 = arith.constant 0 : i32
    return %c0_i32, %c0_i32_0 : i32, i32
  }
  func.func @transform_3(%arg0: i32) -> (i32, i32) {
    %c0_i32 = arith.constant 0 : i32
    %c0_i32_0 = arith.constant 0 : i32
    %c0_i32_1 = arith.constant 0 : i32
    return %c0_i32, %c0_i32_0 : i32, i32
  }
  func.func @transform_4(%arg0: i32) -> (i32, i32) {
    %c0_i32 = arith.constant 0 : i32
    %c0_i32_0 = arith.constant 0 : i32
    %c0_i32_1 = arith.constant 0 : i32
    return %c0_i32, %c0_i32_0 : i32, i32
  }
  func.func @transform_5(%arg0: i32) -> (i32, i32) {
    %c0_i32 = arith.constant 0 : i32
    %c0_i32_0 = arith.constant 0 : i32
    return %arg0, %c0_i32 : i32, i32
  }
}

</mosaic_0001>

<bundles_post_ra>
// kernel: tpu_custom_call.1
= control target key start
LH: loop header
LB: loop body
LE: loop exit
PB: predicated region body
PF: predicated region fallthrough
CT: control target
= control target key end

     0   :  { %10 = vsyncpa [#allocation3], 0  ;;  %s879_s0 = inlined_call_operand.hbm [shape: f32[16,32], index: 0, kind: input, shape index: {}]   ;;  %s880_s1 = inlined_call_operand.hbm [shape: f32[32,55], index: 1, kind: input, shape index: {}]   ;;  %s881_s2 = inlined_call_operand.vmem [shape: f32[1,55], index: 2, kind: input, shape index: {}]   ;;  %s882_s3 = inlined_call_operand.vmem [shape: f32[1,55], index: 3, kind: input, shape index: {}]   ;;  %s883_s4 = inlined_call_operand.vmem [shape: f32[1,55], index: 4, kind: input, shape index: {}]   ;;  %s884_s5 = inlined_call_operand.hbm [shape: f32[16,55], index: 5, kind: output, shape index: {}]  }
   0x1   :  { %12 = vsyncpa [#allocation3 + $0x1], 0 }
   0x2   :  { %13 = vsyncpa [#allocation6], 0 }
   0x3   :  { %14 = vsyncpa [#allocation4], 0 }
   0x4   :  { %16 = vsyncpa [#allocation4 + $0x1], 0  ;;  %s712_s18 = smov 0   ;;  %s714_s19 = smov 0  }
   0x5   :  { %s716_s20 = smov 0   ;;  %s718_s21 = smov 0  }
   0x6 LB: > { %s733_s22 = sadd.s32 4294967295, %s673_s21   ;;  %s454_s23 = sadd.s32 4294967294, %s673_s21   ;;  %s673_s21 = sphi %s718_s21, %s906_s21   ;;  %s669_s20 = sphi %s716_s20, %s905_s20   ;;  %s665_s19 = sphi %s714_s19, %s904_s19   ;;  %s661_s18 = sphi %s712_s18, %s903_s18  }
   0x7   : > { %p42_p0 = scmp.ne.s32.totalorder %s665_s19, %s661_s18  ;;  %p885_p1 = scmp.eq.s32.totalorder %s733_s22, 0 }
   0x8   : > { %p156_p3 = scmp.eq.s32.totalorder %s454_s23, 1  ;;  %p455_p5 = scmp.ge.s32.totalorder %s673_s21, 1 }
   0x9   : > { %p742_p4 = por %p885_p1, %p42_p0  ;;  %p163_p7 = scmp.lt.s32.totalorder %s673_s21, 3 }
   0xa   : > { %p747_p6 = por %p156_p3, %p42_p0  ;;  %s675_s27 = smov [#allocation5]  }
   0xb   : > { %s889_s24 = scalar_select %p742_p4, 1, 0 }
   0xc   : > { %s890_s25 = scalar_select %p747_p6, 1, 0 }
   0xd   : > { %p752_p8 = pnand %p455_p5, %p163_p7  ;;  %s175_s28 = sshll.u32 %s675_s27, 4  ;;  %s176_s28 = int_to_ptr.vmem [resolvable:$true] %s175_s28 }
   0xe   : > { %s766_s30 = sadd.s32 1, %s673_s21   ;;  %s29_s6 = sadd.s32 1, %s669_s20 }
   0xf   : > { %s891_s26 = scalar_select %p752_p8, 1, 0 }
  0x10   : > { %p496_p9 = pneg %p752_p8  ;;  %s26_s7 = ssub.s32 %s673_s21, %s766_s30 }
  0x11   : > { %s562_s8 = scalar_lea.vmem %s176_s28, 512  ;;  %p570_p5 = scmp.lt.s32.totalorder %s176_s28, %s176_s28 }
  0x12   : > { %p761_p11 = pnand %p496_p9, %p885_p1  ;;  %p563_p13 = scmp.ne.s32.totalorder %s176_s28, %s562_s8 }
  0x13   : > { %p571_p7 = scmp.lt.s32.totalorder %s562_s8, %s562_s8 }
  0x14   : > { %p553_p12 = pneg %p761_p11 }
  0x15   : > { %p572_p10 = por %p571_p7, %p570_p5 }
  0x16   : > { %p565_p0 = pnand %p563_p13, %p553_p12 }
  0x18   : > { %p566_p3 = pneg %p565_p0 }
  0x1a   : > { %p573_p2 = pnand %p572_p10, %p566_p3 }
  0x1c   : > { %576 = shalt.err (!%p573_p2)
}
  0x1d   : > { %s676_s9 = smov 128   ;;  %s677_s10 = smov 8  }
  0x1e   : > { %499 = dma.hbm_to_vmem [thread:$0]  (!%p761_p11), %s880_s1, 512, %s176_s28, [#allocation6], %s676_s9, %s676_s9, %s677_s10  }
  0x1f   : > { %p27_p9 = scmp.eq.s32.totalorder %s26_s7, 0  ;;  %p36_p12 = scmp.ne.s32.totalorder %s669_s20, %s665_s19 }
  0x20   : > { %p37_p10 = scmp.eq.s32.totalorder %s673_s21, 0  ;;  %p509_p2 = scmp.lt.s32.totalorder %s673_s21, 2 }
  0x21   : > { %s783_s13 = scalar_select %p27_p9, %s669_s20, %s29_s6  }
  0x22   : > { %p38_p13 = por %p37_p10, %p36_p12  ;;  %p893_p0 = scmp.eq.s32.totalorder %s733_s22, 1 }
  0x23   : > { %s198_s15 = sand.u32 1, %s669_s20   ;;  %s459_s16 = sshll.u32 %s673_s21, 7 }
  0x24   : > { %p787_p3 = por %p893_p0, %p36_p12  ;;  %s458_s17 = sshll.u32 %s198_s15, 3 }
  0x25   : > { %s796_s29 = scalar_lea.hbm %s879_s0, %s459_s16  ;;  %s202_s28 = scalar_lea.vmem [#allocation2], %s458_s17 }
  0x26   : > { %s894_s14 = scalar_select %p787_p3, 1, 0 }
  0x27   : > { %s209_s6 = sshll.u32 %s202_s28, 4  ;;  %p798_p11 = pnand %p509_p2, %p38_p13  ;;  %s210_s6 = int_to_ptr.vmem [resolvable:$true] %s209_s6 }
  0x28   : > { %s199_s8 = scalar_lea.sflag [#allocation3], %s198_s15  ;;  %s577_s9 = scalar_lea.hbm %s796_s29, 128 }
  0x29   : > { %p578_p5 = scmp.ne.s32.totalorder %s796_s29, %s577_s9  ;;  %p579_p7 = pneg %p798_p11 }
  0x2a   : > { %s582_s12 = scalar_lea.hbm %s879_s0, 256  ;;  %p583_p10 = scmp.lt.s32.totalorder %s796_s29, %s879_s0 }
  0x2b   : > { %p580_p9 = pnand %p579_p7, %p578_p5  ;;  %p584_p2 = scmp.lt.s32.totalorder %s582_s12, %s577_s9 }
  0x2d   : > { %p581_p12 = pneg %p580_p9  ;;  %p585_p13 = por %p584_p2, %p583_p10 }
  0x2f   : > { %p586_p0 = pnand %p585_p13, %p581_p12 }
  0x31   : > { %589 = shalt.err (!%p586_p0)
}
  0x32   : > { %s590_s23 = scalar_lea.vmem %s210_s6, 128  ;;  %s678_s15 = smov [#allocation2]  }
  0x33   : > { %p591_p1 = scmp.ne.s32.totalorder %s210_s6, %s590_s23  ;;  %s595_s27 = sshll.u32 %s678_s15, 4  ;;  %s596_s27 = int_to_ptr.vmem [resolvable:$false] %s595_s27 }
  0x34   : > { %s597_s28 = scalar_lea.vmem %s596_s27, 256  ;;  %p598_p5 = scmp.lt.s32.totalorder %s210_s6, %s596_s27 }
  0x35   : > { %p593_p6 = pnand %p591_p1, %p579_p7  ;;  %p599_p9 = scmp.lt.s32.totalorder %s597_s28, %s590_s23 }
  0x37   : > { %p594_p3 = pneg %p593_p6  ;;  %p600_p4 = por %p599_p9, %p598_p5 }
  0x39   : > { %p601_p8 = pnand %p600_p4, %p594_p3 }
  0x3b   : > { %604 = shalt.err (!%p601_p8)
}
  0x3c   : > { %503 = dma.hbm_to_vmem [thread:$0]  (!%p798_p11), %s796_s29, 128, %s210_s6, %s199_s8  }
  0x3d   : > { %p896_p12 = scmp.ne.s32.totalorder %s891_s26, 0 }
  0x3e   : > { %s819_s9 = sand.u32 (!%p896_p12), 1, %s665_s19   ;;  %p897_p1 = scmp.ne.s32.totalorder (!%p896_p12), %s889_s24, 0 }
  0x3f   : > { %218 = sbr.rel (%p896_p12) target bundleno = 307 (0x133), region = 40  ;;  %s461_s10 = sshll.u32 (!%p896_p12), %s819_s9, 3 }
  0x40   : > { %s221_s11 = scalar_lea.sflag (!%p896_p12), [#allocation3], %s819_s9  ;;  %s224_s12 = scalar_lea.vmem (!%p896_p12), [#allocation2], %s461_s10 }
  0x44   : > { %648 = dma.done.wait (%p897_p1), %s221_s11, 128  }
  0x45   : > { %650 = vsyncadd (%p897_p1), %s221_s11, 4294967168  ;;  %p898_p4 = scmp.eq.s32.totalorder %s733_s22, 0 }
  0x47   : > { %652 = dma.done.wait (%p898_p4), [#allocation6], 512   ;;  %p899_p6 = pmov %p898_p4 }
  0x48   : > { %v679_v0 = vmov 0.0   ;;  %vm680_vm0 = vmmov 0   ;;  %v259_v1 = vld [vmem:[#allocation5 + $0x18] sm:$0xff]  ;;  %v258_v2 = vld [vmem:[#allocation5 + $0x10] sm:$0xff]  ;;  %v257_v3 = vld [vmem:[#allocation5 + $0x8] sm:$0xff]  ;;  %vm267_vm1 = vcmask 261120  }
  0x49   : > { %654 = vsyncadd (%p899_p6), [#allocation6], 4294966784  ;;  %477 = vmatprep.subr.mxu0 %v679_v0  ;;  %485 = vmatprep.mubr.msk.f32.mxu0 %vm680_vm0, %v679_v0  ;;  %v256_v4 = vld [vmem:[#allocation5] sm:$0xff]  ;;  %v255_v5 = vld [vmem:[%s224_s12] sm:$0xff]  ;;  %s469_s16 = sshll.u32 %s733_s22, 7  ;;  %s254_s17 = scalar_lea.vmem [#allocation7], %s461_s10 }
  0x4a   : > { %478 = vmatpush3.msra.mxu0 %v259_v1  ;;  %v464_v6 = vld [vmem:[%s881_s2] ss:$0 sm:$0xff]  ;;  %s374_s23 = sshll.u32 %s254_s17, 4  ;;  %vm358_vm2 = vcmask 449536   ;;  %s372_s28 = scalar_lea.hbm %s884_s5, %s469_s16  ;;  %s375_s23 = int_to_ptr.vmem [resolvable:$true] %s374_s23 }
  0x4b   : > { %479 = vmatprep.subr.mxu0 %v679_v0  ;;  %v466_v10 = vld [vmem:[%s882_s3] ss:$0 sm:$0xff]  ;;  %s361_s11 = scalar_lea.sflag [#allocation4], %s819_s9  ;;  %s605_s12 = scalar_lea.vmem %s375_s23, 128 }
  0x4c   : > { %480 = vmatpush3.msra.mxu0 %v258_v2  ;;  %v467_v12 = vld [vmem:[%s883_s4] ss:$0 sm:$0xff]  ;;  %p606_p8 = scmp.ne.s32.totalorder %s375_s23, %s605_s12  ;;  %p900_p3 = scmp.ne.s32.totalorder %s894_s14, 0 }
  0x4d   : > { %481 = vmatprep.subr.mxu0 %v679_v0  ;;  %s681_s24 = smov [#allocation7]  }
  0x4e   : > { %482 = vmatpush3.msra.mxu0 %v257_v3  ;;  %p607_p11 = pnand %p606_p8, %p900_p3  ;;  %s609_s22 = sshll.u32 %s681_s24, 4  ;;  %s610_s22 = int_to_ptr.vmem [resolvable:$false] %s609_s22 }
  0x4f   : > { %483 = vmatprep.subr.mxu0 %v679_v0  ;;  %s611_s10 = scalar_lea.vmem %s610_s22, 256  ;;  %p612_p10 = scmp.lt.s32.totalorder %s375_s23, %s610_s22 }
  0x50   : > { %484 = vmatpush3.msra.mxu0 %v256_v4  ;;  %p608_p7 = pneg %p607_p11  ;;  %p613_p2 = scmp.lt.s32.totalorder %s611_s10, %s605_s12 }
  0x51   : > { %486 = vmatmul.mubr.msk.f32.vlgmr.msra.gmra.mxu0 %vm267_vm1, %v255_v5 }
  0x52   : > { %p614_p13 = por %p613_p2, %p612_p10 }
  0x54   : > { %p615_p0 = pnand %p614_p13, %p608_p7 }
 0x111   : > { %v337_v7 = vpop.f32.mrf.mxu0 }
 0x112   : > { %v338_v8 = vadd.f32 %v464_v6, %v337_v7 }
 0x113   : > { %v487_v9 = vpop.f32.mrf.mxu0 }
 0x114   : > { %549 = vtanh.f32 %v338_v8 }
 0x121   : > { %v550_v11 = vpop.eup %549 }
 0x122   : > { %v349_v13 = vmul.f32 %v550_v11, %v466_v10 }
 0x124   : > { %v357_v14 = vadd.f32 %v467_v12, %v349_v13 }
 0x126   : > { %359 = vst.msk [vmem:[%s254_s17] sm:$0xff] %vm358_vm2, %v357_v14 }
 0x127   : > { %618 = shalt.err (!%p615_p0)
}
 0x128   : > { %s619_s26 = scalar_lea.hbm %s372_s28, 128  ;;  %s623_s6 = scalar_lea.hbm %s884_s5, 256 }
 0x129   : > { %p620_p5 = scmp.ne.s32.totalorder %s372_s28, %s619_s26  ;;  %p624_p1 = scmp.lt.s32.totalorder %s372_s28, %s884_s5 }
 0x12a   : > { %p625_p4 = scmp.lt.s32.totalorder %s623_s6, %s619_s26 }
 0x12b   : > { %p621_p9 = pnand %p620_p5, %p900_p3 }
 0x12c   : > { %p626_p6 = por %p625_p4, %p624_p1 }
 0x12d   : > { %p622_p12 = pneg %p621_p9 }
 0x12f   : > { %p627_p8 = pnand %p626_p6, %p622_p12 }
 0x131   : > { %630 = shalt.err (!%p627_p8)
}
 0x132   : > { %494 = dma.vmem_to_hbm [thread:$0]  (%p900_p3), %s375_s23, 128, %s372_s28, %s361_s11  }
 0x133 PF: > { %s386_s16 = sand.u32 1, %s661_s18   ;;  %p901_p11 = scmp.ne.s32.totalorder %s890_s25, 0 }
 0x134   : > { %p902_p7 = scmp.ge.s32.totalorder %s673_s21, 2  ;;  %s387_s17 = scalar_lea.sflag [#allocation4], %s386_s16 }
 0x136   : > { %p505_p10 = pnand %p902_p7, %p901_p11 }
 0x138   : > { %p506_p2 = pneg %p505_p10 }
 0x13a   : > { %656 = dma.done.wait (%p506_p2), %s387_s17, 128  }
 0x13b   : > { %658 = vsyncadd (%p506_p2), %s387_s17, 4294967168  ;;  %p19_p13 = scmp.ge.s32.totalorder %s766_s30, 4   ;;  %s903_s18 = smov %s665_s19 }
 0x13c   : > { %s904_s19 = smov %s669_s20  ;;  %s905_s20 = smov %s783_s13 }
 0x13d   : > { %s906_s21 = smov %s766_s30  ;;  %21 = sbr.rel (!%p19_p13) target bundleno = 6 (0x6), region = 89 }
 0x142   :  { %392 = vsyncpa [#allocation3], 1 }
 0x143   :  { %394 = vsyncpa [#allocation3 + $0x1], 1 }
 0x144   :  { %395 = vsyncpa [#allocation6], 1 }
 0x145   :  { %396 = vsyncpa [#allocation4], 1 }
 0x146   :  { %398 = vsyncpa [#allocation4 + $0x1], 1 }

</bundles_post_ra>
